<compile_context>
chip_gen: v6e
topology: v6e:2x2x1
jax: 0.10.0
libtpu: 0.0.40
codegen_flags: <defaults>
</compile_context>

<pallas_src>
import numpy as np
import jax
import jax.numpy as jnp
from jax.experimental import pallas as pl
from jax.experimental.pallas import tpu as pltpu


def _edgeconv_kernel(xT_ref, zjT_ref, w1m_ref, b_ref, o_ref):
    # xT_ref : (C, tn)       center features, transposed (points on the lane axis)
    # zjT_ref: (K, Cout, tn) gathered, PRE-PROJECTED neighbor features (Z = W2 @ s_ptsT)
    # w1m_ref: (Cout, C)     W1 - W2   (acts on the center point)
    # b_ref  : (Cout, 1)
    # o_ref  : (Cout, tn)
    k_neighbors = zjT_ref.shape[0]

    # Per-point term (constant over k) — single MXU dot per tile.
    p1 = jnp.dot(w1m_ref[...], xT_ref[...],
                 preferred_element_type=jnp.float32)              # (Cout, tn)

    # K-way max over the pre-projected neighbor tiles — pure VPU, shallow pairwise tree
    # (ReLU/max hoist makes maxing before bias/ReLU exact).
    tiles = [zjT_ref[k] for k in range(k_neighbors)]              # each (Cout, tn)
    while len(tiles) > 1:
        nxt = [jnp.maximum(tiles[i], tiles[i + 1])
               for i in range(0, len(tiles) - 1, 2)]
        if len(tiles) % 2:
            nxt.append(tiles[-1])
        tiles = nxt
    m = tiles[0]                                                  # (Cout, tn)

    o_ref[...] = jnp.maximum(p1 + m + b_ref[...], 0.0).astype(o_ref.dtype)


def edge_conv1d(x, edge_index, w, b, *, tile_n=1024):
    """EdgeConv1d forward. x: (N, C) f32, edge_index: (2, N, K) int,
    w: (Cout, 2C) conv1d(kernel=1) weight, b: (Cout,)."""
    N, C = x.shape
    K = edge_index.shape[-1]
    Cout = w.shape[0]

    # Weight prep (algebraic rewrite):  W1·x + W2·(xj - x) = (W1 - W2)·x + W2·xj
    w1m = w[:, :C] - w[:, C:]          # (Cout, C)
    w2 = w[:, C:]                      # (Cout, C)
    b2 = b.reshape(Cout, 1)

    # Tile size: keep lane-aligned (multiple of 128) and, when N allows, keep >= 2 grid
    # steps so v7x's two TensorCores both get work on the "parallel" axis.
    half = -(-((N + 1) // 2) // 128) * 128        # ceil(N/2) rounded up to 128
    tile_n = max(128, min(int(tile_n), half))
    n_pad = pl.cdiv(N, tile_n) * tile_n

    # Pad N to a multiple of tile_n (padded rows are dropped after the kernel).
    xT = jnp.pad(x.T, ((0, 0), (0, n_pad - N)))                                  # (C, n_pad)
    idxT = jnp.pad(edge_index[0].astype(jnp.int32).T, ((0, 0), (0, n_pad - N)))  # (K, n_pad)

    # XLA glue: dummy far-away point, PROJECT-THEN-GATHER.
    #   Z = W2 @ [x^T | 1e6]  is a tiny (Cout, N+1) matmul done once for all points;
    #   the data-dependent gather then picks columns of Z directly in a lane-dense
    #   (K, Cout, n_pad) layout (points on the minor axis, no layout padding).
    s_ptsT = jnp.concatenate([x.T, jnp.full((C, 1), 1e6, x.dtype)], axis=1)      # (C, N+1)
    z = jnp.dot(w2, s_ptsT)                                                      # (Cout, N+1)
    zjT = jax.vmap(lambda ix: jnp.take(z, ix, axis=1))(idxT)                     # (K, Cout, n_pad)

    grid = (n_pad // tile_n,)
    out_t = pl.pallas_call(
        _edgeconv_kernel,
        out_shape=jax.ShapeDtypeStruct((Cout, n_pad), x.dtype),
        grid_spec=pltpu.PrefetchScalarGridSpec(
            num_scalar_prefetch=0,
            grid=grid,
            in_specs=[
                pl.BlockSpec((C, tile_n), lambda i: (0, i)),
                pl.BlockSpec((K, Cout, tile_n), lambda i: (0, 0, i)),
                pl.BlockSpec((Cout, C), lambda i: (0, 0)),
                pl.BlockSpec((Cout, 1), lambda i: (0, 0)),
            ],
            out_specs=pl.BlockSpec((Cout, tile_n), lambda i: (0, i)),
        ),
        compiler_params=pltpu.CompilerParams(
            dimension_semantics=("parallel",)),
    )(xT, zjT, w1m, b2)

    # Back to the module's (N, Cout) layout. Done once here, outside the kernel; downstream
    # consumers that prefer the channel-minor (Cout, N) layout can take out_t[:, :N] instead.
    return out_t[:, :N].T


def plain_graph_block1d(inputs, w, b, *, tile_n=1024):
    """PlainGraphBlock1d.forward: ((x, edge_index)) -> (body(x, edge_index), edge_index)."""
    x, edge_index = inputs
    return edge_conv1d(x, edge_index, w, b, tile_n=tile_n), edge_index


def _reference(x, edge_index, w, b):
    """Pure-JAX reference mirroring the PyTorch code."""
    N, C = x.shape
    K = edge_index.shape[-1]
    x_i = jnp.repeat(x[:, :, None], K, axis=-1)                           # (N, C, K)
    s_pts = jnp.concatenate([x, jnp.full((1, C), 1e6, x.dtype)], axis=0)  # (N+1, C)
    x_j = jnp.take(s_pts, edge_index[0], axis=0).transpose(0, 2, 1)       # (N, C, K)
    feat = jnp.concatenate([x_i, x_j - x_i], axis=1)                      # (N, 2C, K)
    y = jnp.einsum('oc,ncK->noK', w, feat) + b[None, :, None]             # (N, Cout, K)
    y = jnp.maximum(y, 0.0)
    return jnp.max(y, axis=-1)                                            # (N, Cout)


if __name__ == "__main__":
    # Small demo sizes: N=2048 points, C=16 channels, K=9 neighbors.
    # tile_n=1024 -> 2 "parallel" grid steps (keeps both v7x TensorCores busy).
    N, C, K = 2048, 16, 9
    key = jax.random.PRNGKey(0)
    kx, ke, kw, kb = jax.random.split(key, 4)

    x = jax.random.normal(kx, (N, C), dtype=jnp.float32)
    # Neighbor indices in [0, N]; index N hits the 1e6 dummy point.
    edge_index = jax.random.randint(ke, (2, N, K), 0, N + 1, dtype=jnp.int32)

    # Conv1d(2C, C, kernel_size=1, bias=True) parameters (deterministic init).
    w = (jax.random.normal(kw, (C, 2 * C), dtype=jnp.float32)
         * (1.0 / np.sqrt(2 * C)))
    b = jax.random.normal(kb, (C,), dtype=jnp.float32) * 0.1

    out, ei_out = plain_graph_block1d((x, edge_index), w, b, tile_n=1024)
    out = jax.block_until_ready(out)

    ref = _reference(x, edge_index, w, b)
    # rtol covers f32 re-association of the rewritten math around the 1e6 sentinel rows
    # (values up to ~1e7); atol covers near-zero post-ReLU outputs.
    np.testing.assert_allclose(np.asarray(out), np.asarray(ref), rtol=1e-4, atol=1e-3)
    assert ei_out.shape == edge_index.shape

    print("KERNEL_OK")
</pallas_src>

<mosaic_0001>
module attributes {stable_mosaic.version = 11 : i64} {
  func.func @_edgeconv_kernel(%arg0: i32, %arg1: memref<16x1024xf32, #tpu.memory_space<vmem>>, %arg2: memref<9x16x1024xf32, #tpu.memory_space<vmem>>, %arg3: memref<16x16xf32, #tpu.memory_space<vmem>>, %arg4: memref<16x1xf32, #tpu.memory_space<vmem>>, %arg5: memref<16x1024xf32, #tpu.memory_space<vmem>>) attributes {dimension_semantics = [#tpu.dimension_semantics<parallel>], iteration_bounds = array<i64: 2>, scalar_prefetch = 0 : i64, scratch_operands = 0 : i64, tpu.core_type = #tpu.core_type<tc>, window_params = [{transform_indices = @transform_0, window_bounds = array<i64: 16, 1024>}, {transform_indices = @transform_1, window_bounds = array<i64: 9, 16, 1024>}, {pipeline_mode = #tpu.pipeline_mode<synchronous>, transform_indices = @transform_2, window_bounds = array<i64: 16, 16>}, {pipeline_mode = #tpu.pipeline_mode<synchronous>, transform_indices = @transform_3, window_bounds = array<i64: 16, 1>}, {transform_indices = @transform_4, window_bounds = array<i64: 16, 1024>}]} {
    %c0 = arith.constant 0 : index
    %c0_0 = arith.constant 0 : index
    %0 = vector.load %arg3[%c0, %c0_0] : memref<16x16xf32, #tpu.memory_space<vmem>>, vector<16x16xf32>
    %c0_1 = arith.constant 0 : index
    %c0_2 = arith.constant 0 : index
    %1 = vector.load %arg1[%c0_1, %c0_2] : memref<16x1024xf32, #tpu.memory_space<vmem>>, vector<16x1024xf32>
    %cst = arith.constant dense<0.000000e+00> : vector<16x1024xf32>
    %2 = tpu.matmul %0, %1, %cst {dimension_numbers = #tpu.dot_dimension_numbers<[1], [0], [0], [1], [0, 0, 1, 1], [], []>} : vector<16x16xf32>, vector<16x1024xf32>, vector<16x1024xf32> -> vector<16x1024xf32>
    %c0_3 = arith.constant 0 : index
    %c0_4 = arith.constant 0 : index
    %c0_5 = arith.constant 0 : index
    %3 = vector.load %arg2[%c0_3, %c0_4, %c0_5] : memref<9x16x1024xf32, #tpu.memory_space<vmem>>, vector<1x16x1024xf32>
    %4 = vector.shape_cast %3 : vector<1x16x1024xf32> to vector<16x1024xf32>
    %c1 = arith.constant 1 : index
    %c0_6 = arith.constant 0 : index
    %c0_7 = arith.constant 0 : index
    %5 = vector.load %arg2[%c1, %c0_6, %c0_7] : memref<9x16x1024xf32, #tpu.memory_space<vmem>>, vector<1x16x1024xf32>
    %6 = vector.shape_cast %5 : vector<1x16x1024xf32> to vector<16x1024xf32>
    %c2 = arith.constant 2 : index
    %c0_8 = arith.constant 0 : index
    %c0_9 = arith.constant 0 : index
    %7 = vector.load %arg2[%c2, %c0_8, %c0_9] : memref<9x16x1024xf32, #tpu.memory_space<vmem>>, vector<1x16x1024xf32>
    %8 = vector.shape_cast %7 : vector<1x16x1024xf32> to vector<16x1024xf32>
    %c3 = arith.constant 3 : index
    %c0_10 = arith.constant 0 : index
    %c0_11 = arith.constant 0 : index
    %9 = vector.load %arg2[%c3, %c0_10, %c0_11] : memref<9x16x1024xf32, #tpu.memory_space<vmem>>, vector<1x16x1024xf32>
    %10 = vector.shape_cast %9 : vector<1x16x1024xf32> to vector<16x1024xf32>
    %c4 = arith.constant 4 : index
    %c0_12 = arith.constant 0 : index
    %c0_13 = arith.constant 0 : index
    %11 = vector.load %arg2[%c4, %c0_12, %c0_13] : memref<9x16x1024xf32, #tpu.memory_space<vmem>>, vector<1x16x1024xf32>
    %12 = vector.shape_cast %11 : vector<1x16x1024xf32> to vector<16x1024xf32>
    %c5 = arith.constant 5 : index
    %c0_14 = arith.constant 0 : index
    %c0_15 = arith.constant 0 : index
    %13 = vector.load %arg2[%c5, %c0_14, %c0_15] : memref<9x16x1024xf32, #tpu.memory_space<vmem>>, vector<1x16x1024xf32>
    %14 = vector.shape_cast %13 : vector<1x16x1024xf32> to vector<16x1024xf32>
    %c6 = arith.constant 6 : index
    %c0_16 = arith.constant 0 : index
    %c0_17 = arith.constant 0 : index
    %15 = vector.load %arg2[%c6, %c0_16, %c0_17] : memref<9x16x1024xf32, #tpu.memory_space<vmem>>, vector<1x16x1024xf32>
    %16 = vector.shape_cast %15 : vector<1x16x1024xf32> to vector<16x1024xf32>
    %c7 = arith.constant 7 : index
    %c0_18 = arith.constant 0 : index
    %c0_19 = arith.constant 0 : index
    %17 = vector.load %arg2[%c7, %c0_18, %c0_19] : memref<9x16x1024xf32, #tpu.memory_space<vmem>>, vector<1x16x1024xf32>
    %18 = vector.shape_cast %17 : vector<1x16x1024xf32> to vector<16x1024xf32>
    %c8 = arith.constant 8 : index
    %c0_20 = arith.constant 0 : index
    %c0_21 = arith.constant 0 : index
    %19 = vector.load %arg2[%c8, %c0_20, %c0_21] : memref<9x16x1024xf32, #tpu.memory_space<vmem>>, vector<1x16x1024xf32>
    %20 = vector.shape_cast %19 : vector<1x16x1024xf32> to vector<16x1024xf32>
    %21 = arith.maximumf %4, %6 : vector<16x1024xf32>
    %22 = arith.maximumf %8, %10 : vector<16x1024xf32>
    %23 = arith.maximumf %12, %14 : vector<16x1024xf32>
    %24 = arith.maximumf %16, %18 : vector<16x1024xf32>
    %25 = arith.maximumf %21, %22 : vector<16x1024xf32>
    %26 = arith.maximumf %23, %24 : vector<16x1024xf32>
    %27 = arith.maximumf %25, %26 : vector<16x1024xf32>
    %28 = arith.maximumf %27, %20 : vector<16x1024xf32>
    %29 = arith.addf %2, %28 : vector<16x1024xf32>
    %c0_22 = arith.constant 0 : index
    %c0_23 = arith.constant 0 : index
    %30 = vector.load %arg4[%c0_22, %c0_23] : memref<16x1xf32, #tpu.memory_space<vmem>>, vector<16x1xf32>
    %31 = vector.broadcast %30 : vector<16x1xf32> to vector<16x1024xf32>
    %32 = arith.addf %29, %31 : vector<16x1024xf32>
    %cst_24 = arith.constant 0.000000e+00 : f32
    %33 = vector.broadcast %cst_24 : f32 to vector<16x1024xf32>
    %34 = arith.maximumf %32, %33 : vector<16x1024xf32>
    %c0_25 = arith.constant 0 : index
    %c0_26 = arith.constant 0 : index
    %35 = vector.load %arg5[%c0_25, %c0_26] : memref<16x1024xf32, #tpu.memory_space<vmem>>, vector<16x1024xf32>
    tpu.vector_store %arg5[%c0_25, %c0_26], %34 {strides = array<i32>} : memref<16x1024xf32, #tpu.memory_space<vmem>>, vector<16x1024xf32>,
    return
  }
  func.func @transform_0(%arg0: i32) -> (i32, i32) {
    %c0_i32 = arith.constant 0 : i32
    %c0_i32_0 = arith.constant 0 : i32
    return %c0_i32, %arg0 : i32, i32
  }
  func.func @transform_1(%arg0: i32) -> (i32, i32, i32) {
    %c0_i32 = arith.constant 0 : i32
    %c0_i32_0 = arith.constant 0 : i32
    %c0_i32_1 = arith.constant 0 : i32
    return %c0_i32, %c0_i32_0, %arg0 : i32, i32, i32
  }
  func.func @transform_2(%arg0: i32) -> (i32, i32) {
    %c0_i32 = arith.constant 0 : i32
    %c0_i32_0 = arith.constant 0 : i32
    %c0_i32_1 = arith.constant 0 : i32
    return %c0_i32, %c0_i32_0 : i32, i32
  }
  func.func @transform_3(%arg0: i32) -> (i32, i32) {
    %c0_i32 = arith.constant 0 : i32
    %c0_i32_0 = arith.constant 0 : i32
    %c0_i32_1 = arith.constant 0 : i32
    return %c0_i32, %c0_i32_0 : i32, i32
  }
  func.func @transform_4(%arg0: i32) -> (i32, i32) {
    %c0_i32 = arith.constant 0 : i32
    %c0_i32_0 = arith.constant 0 : i32
    return %c0_i32, %arg0 : i32, i32
  }
}

</mosaic_0001>

<bundles_post_ra>
// kernel: tpu_custom_call.1
= control target key start
LH: loop header
LB: loop body
LE: loop exit
PB: predicated region body
PF: predicated region fallthrough
CT: control target
= control target key end

     0   :  { %s2305_s0 = inlined_call_operand.hbm [shape: f32[16,2048], index: 0, kind: input, shape index: {}]   ;;  %s2306_s1 = inlined_call_operand.hbm [shape: f32[9,16,2048], index: 1, kind: input, shape index: {}]   ;;  %s2307_s2 = inlined_call_operand.hbm [shape: f32[16,16], index: 2, kind: input, shape index: {}]   ;;  %s2308_s3 = inlined_call_operand.vmem [shape: f32[16,1], index: 3, kind: input, shape index: {}]   ;;  %s2309_s4 = inlined_call_operand.hbm [shape: f32[16,2048], index: 4, kind: output, shape index: {}]  }
   0x1   :  { %2313 = sst [smem:[#allocation14_spill]] %s2305_s0 }
   0x2   :  { %2314 = sst [smem:[#allocation15_spill]] %s2307_s2 }
   0x3   :  { %9 = vsyncpa [#allocation3], 0 }
   0x4   :  { %11 = vsyncpa [#allocation3 + $0x1], 0 }
   0x5   :  { %12 = vsyncpa [#allocation6], 0 }
   0x6   :  { %14 = vsyncpa [#allocation6 + $0x1], 0 }
   0x7   :  { %15 = vsyncpa [#allocation4], 0 }
   0x8   :  { %17 = vsyncpa [#allocation4 + $0x1], 0  ;;  %s1492_s15 = smov 0   ;;  %s1494_s16 = smov 0  }
   0x9   :  { %s1496_s17 = smov 0   ;;  %s1498_s18 = smov 0  }
   0xa LB: > { %s1513_s19 = sadd.s32 4294967295, %s1451_s18   ;;  %s1065_s20 = sadd.s32 4294967294, %s1451_s18   ;;  %s1451_s18 = sphi %s1498_s18, %s2334_s18   ;;  %s1447_s17 = sphi %s1496_s17, %s2333_s17   ;;  %s1443_s16 = sphi %s1494_s16, %s2332_s16   ;;  %s1439_s15 = sphi %s1492_s15, %s2331_s15  }
   0xb   : > { %s1517_s21 = sadd.s32 1, %s1451_s18   ;;  %s30_s22 = sadd.s32 1, %s1447_s17 }
   0xc   : > { %s27_s23 = ssub.s32 %s1451_s18, %s1517_s21  ;;  %p37_p0 = scmp.ne.s32.totalorder %s1447_s17, %s1443_s16 }
   0xd   : > { %p28_p1 = scmp.eq.s32.totalorder %s27_s23, 0  ;;  %p38_p2 = scmp.eq.s32.totalorder %s1451_s18, 0 }
   0xe   : > { %p43_p3 = scmp.ne.s32.totalorder %s1443_s16, %s1439_s15  ;;  %p44_p4 = scmp.eq.s32.totalorder %s1513_s19, 0 }
   0xf   : > { %s1529_s24 = scalar_select %p28_p1, %s1447_s17, %s30_s22  }
  0x10   : > { %p1531_p5 = por %p38_p2, %p37_p0  ;;  %p1537_p6 = por %p44_p4, %p43_p3 }
  0x11   : > { %2315 = sst [smem:[#allocation13_spill]] %s1529_s24  ;;  %p135_p7 = scmp.eq.s32.totalorder %s1513_s19, 1 }
  0x12   : > { %s2317_s26 = scalar_select %p1537_p6, 1, 0 }
  0x13   : > { %p141_p8 = scmp.eq.s32.totalorder %s1065_s20, 1  ;;  %p1066_p9 = scmp.ge.s32.totalorder %s1451_s18, 1 }
  0x14   : > { %p148_p10 = scmp.lt.s32.totalorder %s1451_s18, 3  ;;  %p1544_p11 = por %p135_p7, %p37_p0 }
  0x15   : > { %p1548_p12 = por %p141_p8, %p43_p3  ;;  %s1453_s30 = smov [#allocation7]  }
  0x16   : > { %s2318_s27 = scalar_select %p1544_p11, 1, 0 }
  0x17   : > { %s2319_s28 = scalar_select %p1548_p12, 1, 0 }
  0x18   : > { %p1552_p13 = pnand %p1066_p9, %p148_p10  ;;  %s160_s5 = sshll.u32 %s1453_s30, 4  ;;  %s161_s5 = int_to_ptr.vmem [resolvable:$true] %s160_s5 }
  0x19   : > { %p1250_p3 = scmp.lt.s32.totalorder %s1451_s18, 2  ;;  %s1567_s7 = sand.u32 1, %s1447_s17  }
  0x1a   : > { %s2320_s29 = scalar_select %p1552_p13, 1, 0 }
  0x1b   : > { %p1234_p1 = pneg %p1552_p13  ;;  %s1308_s8 = scalar_lea.vmem %s161_s5, 256 }
  0x1c   : > { %p1309_p8 = scmp.ne.s32.totalorder %s161_s5, %s1308_s8  ;;  %p1316_p12 = scmp.lt.s32.totalorder %s161_s5, %s161_s5 }
  0x1d   : > { %p1560_p2 = pnand %p1234_p1, %p44_p4  ;;  %p1317_p11 = scmp.lt.s32.totalorder %s1308_s8, %s1308_s8 }
  0x1f   : > { %p1299_p7 = pneg %p1560_p2  ;;  %p1318_p6 = por %p1317_p11, %p1316_p12 }
  0x21   : > { %p1311_p9 = pnand %p1309_p8, %p1299_p7 }
  0x23   : > { %p1312_p10 = pneg %p1311_p9 }
  0x25   : > { %p1319_p13 = pnand %p1318_p6, %p1312_p10 }
  0x27   : > { %1322 = shalt.err (!%p1319_p13)
}
  0x28   : > { %s1454_s9 = smov 128   ;;  %s1455_s10 = smov 8  }
  0x29   : > { %s2322_s2 = sld [smem:[#allocation15_spill]]  ;;  %p1580_p11 = pnand %p1250_p3, %p1531_p5 }
  0x2a   : > { %s1069_s14 = sshll.u32 %s1567_s7, 7  ;;  %s1219_s20 = sshll.u32 %s1451_s18, 10 }
  0x2b   : > { %s2324_s0 = sld [smem:[#allocation14_spill]]  ;;  %s1222_s6 = smul.u32 1152, %s1567_s7 }
  0x2c   : > { %s178_s8 = scalar_lea.sflag [#allocation3], %s1567_s7  ;;  %p1325_p6 = pneg %p1580_p11 }
  0x2f   : > { %1237 = dma.hbm_to_vmem [thread:$0]  (!%p1560_p2), %s2322_s2, 256, %s161_s5, [#allocation6], %s1454_s9, %s1454_s9, %s1455_s10  }
  0x30   : > { %s181_s5 = scalar_lea.vmem [#allocation2], %s1069_s14 }
  0x31   : > { %s1591_s30 = scalar_lea.hbm %s2324_s0, %s1219_s20  ;;  %s188_s25 = sshll.u32 %s181_s5, 4  ;;  %s1593_s25 = int_to_ptr.vmem [resolvable:$true] %s188_s25 }
  0x32   : > { %s1323_s9 = scalar_lea.hbm %s1591_s30, 2048  ;;  %s1328_s12 = scalar_lea.hbm %s2324_s0, 4096 }
  0x33   : > { %p1324_p5 = scmp.ne.s32.totalorder %s1591_s30, %s1323_s9  ;;  %p1329_p1 = scmp.lt.s32.totalorder %s1591_s30, %s2324_s0 }
  0x34   : > { %p1330_p2 = scmp.lt.s32.totalorder %s1328_s12, %s1323_s9 }
  0x35   : > { %p1326_p12 = pnand %p1325_p6, %p1324_p5 }
  0x36   : > { %p1331_p3 = por %p1330_p2, %p1329_p1 }
  0x37   : > { %p1327_p13 = pneg %p1326_p12 }
  0x39   : > { %p1332_p7 = pnand %p1331_p3, %p1327_p13 }
  0x3b   : > { %1335 = shalt.err (!%p1332_p7)
}
  0x3c   : > { %s1336_s14 = scalar_lea.vmem %s1593_s25, 2048  ;;  %s1456_s5 = smov [#allocation2]  }
  0x3d   : > { %p1337_p8 = scmp.ne.s32.totalorder %s1593_s25, %s1336_s14  ;;  %s1341_s10 = sshll.u32 %s1456_s5, 4  ;;  %s1342_s10 = int_to_ptr.vmem [resolvable:$false] %s1341_s10 }
  0x3e   : > { %s1343_s11 = scalar_lea.vmem %s1342_s10, 4096  ;;  %p1344_p5 = scmp.lt.s32.totalorder %s1593_s25, %s1342_s10 }
  0x3f   : > { %p1339_p9 = pnand %p1337_p8, %p1325_p6  ;;  %p1345_p12 = scmp.lt.s32.totalorder %s1343_s11, %s1336_s14 }
  0x41   : > { %p1340_p10 = pneg %p1339_p9  ;;  %p1346_p0 = por %p1345_p12, %p1344_p5 }
  0x43   : > { %p1347_p1 = pnand %p1346_p0, %p1340_p10 }
  0x45   : > { %1350 = shalt.err (!%p1347_p1)
}
  0x46   : > { %s1457_s9 = smov 2048   ;;  %s1458_s12 = smov 1024  }
  0x47   : > { %s1459_s22 = smov 64   ;;  %s1631_s5 = scalar_lea.hbm %s2306_s1, %s1219_s20 }
  0x48   : > { %1241 = dma.hbm_to_vmem [thread:$0]  (!%p1580_p11), %s1591_s30, 2048, %s1593_s25, %s178_s8, %s1457_s9, %s1458_s12, %s1459_s22  }
  0x49   : > { %s198_s10 = sand.u32 1, %s1451_s18   ;;  %s202_s11 = scalar_lea.vmem [#allocation5], %s1222_s6 }
  0x4a   : > { %s209_s0 = sshll.u32 %s202_s11, 4  ;;  %s199_s2 = scalar_lea.sflag [#allocation6], %s198_s10  ;;  %s1636_s0 = int_to_ptr.vmem [resolvable:$true] %s209_s0 }
  0x4b   : > { %s1351_s24 = scalar_lea.hbm %s1631_s5, 18432  ;;  %s1356_s20 = scalar_lea.hbm %s2306_s1, 36864 }
  0x4c   : > { %p1352_p0 = scmp.ne.s32.totalorder %s1631_s5, %s1351_s24  ;;  %p1357_p3 = scmp.lt.s32.totalorder %s1631_s5, %s2306_s1 }
  0x4d   : > { %p1358_p7 = scmp.lt.s32.totalorder %s1356_s20, %s1351_s24 }
  0x4e   : > { %p1354_p13 = pnand %p1352_p0, %p1325_p6 }
  0x4f   : > { %p1359_p8 = por %p1358_p7, %p1357_p3 }
  0x50   : > { %p1355_p2 = pneg %p1354_p13 }
  0x52   : > { %p1360_p9 = pnand %p1359_p8, %p1355_p2 }
  0x54   : > { %1363 = shalt.err (!%p1360_p9)
}
  0x55   : > { %s1364_s7 = scalar_lea.vmem %s1636_s0, 18432  ;;  %s1460_s6 = smov [#allocation5]  }
  0x56   : > { %p1365_p10 = scmp.ne.s32.totalorder %s1636_s0, %s1364_s7  ;;  %s1369_s14 = sshll.u32 %s1460_s6, 4  ;;  %s1370_s14 = int_to_ptr.vmem [resolvable:$false] %s1369_s14 }
  0x57   : > { %s1371_s10 = scalar_lea.vmem %s1370_s14, 36864  ;;  %p1372_p1 = scmp.lt.s32.totalorder %s1636_s0, %s1370_s14 }
  0x58   : > { %p1367_p5 = pnand %p1365_p10, %p1325_p6  ;;  %p1373_p0 = scmp.lt.s32.totalorder %s1371_s10, %s1364_s7 }
  0x5a   : > { %p1368_p12 = pneg %p1367_p5  ;;  %p1374_p13 = por %p1373_p0, %p1372_p1 }
  0x5c   : > { %p1375_p3 = pnand %p1374_p13, %p1368_p12 }
  0x5e   : > { %1378 = shalt.err (!%p1375_p3)
}
  0x5f   : > { %1244 = dma.hbm_to_vmem [thread:$0]  (!%p1580_p11), %s1631_s5, 18432, %s1636_s0, %s199_s2, %s1457_s9, %s1458_s12, %s1459_s22  }
  0x60   : > { %p2325_p6 = scmp.ne.s32.totalorder %s2320_s29, 0 }
  0x61   : > { %s1666_s24 = sand.u32 (!%p2325_p6), 1, %s1443_s16   ;;  %p2326_p2 = scmp.ne.s32.totalorder (!%p2325_p6), %s2317_s26, 0 }
  0x62   : > { %221 = sbr.rel (%p2325_p6) target bundleno = 345 (0x159), region = 36  ;;  %s1075_s11 = sshll.u32 (!%p2325_p6), %s1666_s24, 7 }
  0x63   : > { %s224_s30 = scalar_lea.sflag (!%p2325_p6), [#allocation3], %s1666_s24  ;;  %s1672_s13 = scalar_lea.vmem (!%p2325_p6), [#allocation2], %s1075_s11 }
  0x67   : > { %1422 = dma.done.wait (%p2326_p2), %s224_s30, 2048  }
  0x68   : > { %1424 = vsyncadd (%p2326_p2), %s224_s30, 4294965248  ;;  %s232_s0 = sand.u32 1, %s1513_s19   ;;  %s1223_s2 = smul.u32 1152, %s1666_s24 }
  0x69   : > { %s233_s29 = scalar_lea.sflag [#allocation6], %s232_s0 }
  0x6a   : > { %s1680_s9 = scalar_lea.vmem [#allocation5], %s1223_s2 }
  0x6b   : > { %1426 = dma.done.wait (%p2326_p2), %s233_s29, 18432  }
  0x6c   : > { %1428 = vsyncadd (%p2326_p2), %s233_s29, 4294948864 }
  0x6d   : > { %1430 = dma.done.wait (%p44_p4), [#allocation6], 256  }
  0x6e   : > { %1432 = vsyncadd (%p44_p4), [#allocation6], 4294967040  ;;  %v1461_v0 = vmov 0.0   ;;  %v1462_v1 = vmov 0   ;;  %v284_v2 = vld [vmem:[%s1672_s13 + $0x48] sm:$0xff]  ;;  %v286_v3 = vld [vmem:[%s1672_s13 + $0x58] sm:$0xff] }
  0x6f   : > { %642 = vmatprep.mubr.f32.mxu0 %v1461_v0  ;;  %719 = vmatprep.mubr.f32.mxu1 %v1461_v0  ;;  %v283_v4 = vld [vmem:[%s1672_s13 + $0x40] sm:$0xff]  ;;  %v285_v5 = vld [vmem:[%s1672_s13 + $0x50] sm:$0xff]  ;;  %v276_v6 = vld [vmem:[%s1672_s13 + $0x8] sm:$0xff]  ;;  %vm571_vm0 = vcmask 130048   ;;  %s2223_s25 = scalar_lea.vmem [#allocation8], %s1075_s11  ;;  %s1221_s20 = sshll.u32 %s1513_s19, 10 }
  0x70   : > { %1296 = vset.pattern.permute.xlu0 %v1462_v1  ;;  %606 = vmatprep.subr.mxu0 %v284_v2  ;;  %v278_v7 = vld [vmem:[%s1672_s13 + $0x18] sm:$0xff]  ;;  %v275_v8 = vld [vmem:[%s1672_s13] sm:$0xff]  ;;  %v277_v9 = vld [vmem:[%s1672_s13 + $0x10] sm:$0xff]  ;;  %s960_s8 = sshll.u32 %s2223_s25, 4  ;;  %s2254_s7 = scalar_lea.hbm %s2309_s4, %s1221_s20  ;;  %s2258_s8 = int_to_ptr.vmem [resolvable:$true] %s960_s8 }
  0x71   : > { %683 = vmatprep.subr.mxu1 %v286_v3  ;;  %607 = vmatpush1.msra.mxu0 %v283_v4  ;;  %v273_v10 = vld [vmem:[#allocation7] sm:$0xff]  ;;  %v288_v11 = vld [vmem:[%s1672_s13 + $0x68] sm:$0xff]  ;;  %v290_v12 = vld [vmem:[%s1672_s13 + $0x78] sm:$0xff]  ;;  %s947_s6 = scalar_lea.sflag [#allocation4], %s1666_s24  ;;  %s1379_s14 = scalar_lea.vmem %s2258_s8, 2048 }
  0x72   : > { %684 = vmatpush1.msra.mxu1 %v285_v5  ;;  %608 = vmatprep.subr.mxu0 %v276_v6  ;;  %v287_v13 = vld [vmem:[%s1672_s13 + $0x60] sm:$0xff]  ;;  %v289_v14 = vld [vmem:[%s1672_s13 + $0x70] sm:$0xff]  ;;  %v274_v15 = vld [vmem:[#allocation7 + $0x8] sm:$0xff]  ;;  %p1380_p4 = scmp.ne.s32.totalorder %s2258_s8, %s1379_s14  ;;  %p2327_p11 = scmp.ne.s32.totalorder %s2318_s27, 0 }
  0x73   : > { %685 = vmatprep.subr.mxu1 %v278_v7  ;;  %609 = vmatpush1.msra.mxu0 %v275_v8  ;;  %v280_v16 = vld [vmem:[%s1672_s13 + $0x28] sm:$0xff]  ;;  %v282_v17 = vld [vmem:[%s1672_s13 + $0x38] sm:$0xff]  ;;  %v279_v18 = vld [vmem:[%s1672_s13 + $0x20] sm:$0xff]  ;;  %s1463_s10 = smov [#allocation8]  }
  0x74   : > { %686 = vmatpush1.msra.mxu1 %v277_v9  ;;  %1206 = vmatmul.mubr.msk.f32.vlgmr.msra.gmra.mxu0 %vm571_vm0, %v273_v10  ;;  %v281_v19 = vld [vmem:[%s1672_s13 + $0x30] sm:$0xff]  ;;  %v886_v20 = vld [vmem:[%s2308_s3] sm:$0xff]  ;;  %v887_v21 = vld [vmem:[%s2308_s3 + $0x8] sm:$0xff]  ;;  %p1381_p7 = pnand %p1380_p4, %p2327_p11  ;;  %s1383_s11 = sshll.u32 %s1463_s10, 4  ;;  %s1384_s11 = int_to_ptr.vmem [resolvable:$false] %s1383_s11 }
  0x75   : > { %1208 = vmatmul.mubr.msk.f32.vlgmr.msra.gmra.mxu1 %vm571_vm0, %v273_v10  ;;  %760 = vmatprep.subr.mxu0 %v288_v11  ;;  %v1721_v22 = vld [vmem:[%s1680_s9] sm:$0xff]  ;;  %v1745_v30 = vld [vmem:[%s1680_s9 + $0x10] sm:$0xff]  ;;  %v1769_v38 = vld [vmem:[%s1680_s9 + $0x8] sm:$0xff]  ;;  %s1385_s30 = scalar_lea.vmem %s1384_s11, 4096  ;;  %p1386_p9 = scmp.lt.s32.totalorder %s2258_s8, %s1384_s11 }
  0x76   : > { %837 = vmatprep.subr.mxu1 %v290_v12  ;;  %761 = vmatpush1.msra.mxu0 %v287_v13  ;;  %v1724_v23 = vld [vmem:[%s1680_s9 + $0x80] sm:$0xff]  ;;  %v1748_v31 = vld [vmem:[%s1680_s9 + $0x90] sm:$0xff]  ;;  %v1772_v39 = vld [vmem:[%s1680_s9 + $0x88] sm:$0xff]  ;;  %p1382_p8 = pneg %p1381_p7  ;;  %p1387_p10 = scmp.lt.s32.totalorder %s1385_s30, %s1379_s14 }
  0x77   : > { %838 = vmatpush1.msra.mxu1 %v289_v14  ;;  %648 = vmatprep.mubr.f32.mxu0 %v1461_v0  ;;  %v1727_v24 = vld [vmem:[%s1680_s9 + $0x100] sm:$0xff]  ;;  %v1751_v32 = vld [vmem:[%s1680_s9 + $0x110] sm:$0xff]  ;;  %v1775_v40 = vld [vmem:[%s1680_s9 + $0x108] sm:$0xff]  ;;  %v443_v58 = vmax.f32 %v1721_v22, %v1724_v23  ;;  %v445_v1 = vmax.f32 %v1745_v30, %v1748_v31  ;;  %v444_v8 = vmax.f32 %v1769_v38, %v1772_v39 }
  0x78   : > { %725 = vmatprep.mubr.f32.mxu1 %v1461_v0  ;;  %1207 = vmatmul.mubr.msk.f32.gmra.mxu0 %vm571_vm0, %v274_v15  ;;  %v1730_v25 = vld [vmem:[%s1680_s9 + $0x180] sm:$0xff]  ;;  %v1754_v33 = vld [vmem:[%s1680_s9 + $0x190] sm:$0xff]  ;;  %v1778_v41 = vld [vmem:[%s1680_s9 + $0x188] sm:$0xff]  ;;  %p1388_p5 = por %p1387_p10, %p1386_p9 }
  0x79   : > { %1209 = vmatmul.mubr.msk.f32.gmra.mxu1 %vm571_vm0, %v274_v15  ;;  %762 = vmatprep.subr.mxu0 %v280_v16  ;;  %v1733_v26 = vld [vmem:[%s1680_s9 + $0x200] sm:$0xff]  ;;  %v1757_v34 = vld [vmem:[%s1680_s9 + $0x210] sm:$0xff]  ;;  %v1781_v42 = vld [vmem:[%s1680_s9 + $0x208] sm:$0xff]  ;;  %v459_v59 = vmax.f32 %v1727_v24, %v1730_v25  ;;  %v461_v2 = vmax.f32 %v1751_v32, %v1754_v33  ;;  %v460_v9 = vmax.f32 %v1775_v40, %v1778_v41 }
  0x7a   : > { %839 = vmatprep.subr.mxu1 %v282_v17  ;;  %763 = vmatpush1.msra.mxu0 %v279_v18  ;;  %v1736_v27 = vld [vmem:[%s1680_s9 + $0x280] sm:$0xff]  ;;  %v1760_v35 = vld [vmem:[%s1680_s9 + $0x290] sm:$0xff]  ;;  %v1784_v43 = vld [vmem:[%s1680_s9 + $0x288] sm:$0xff]  ;;  %p1389_p12 = pnand %p1388_p5, %p1382_p8 }
  0x7b   : > { %840 = vmatpush1.msra.mxu1 %v281_v19  ;;  %796 = vmatprep.mubr.f32.mxu0 %v1461_v0  ;;  %v1739_v28 = vld [vmem:[%s1680_s9 + $0x300] sm:$0xff]  ;;  %v1763_v36 = vld [vmem:[%s1680_s9 + $0x310] sm:$0xff]  ;;  %v1787_v44 = vld [vmem:[%s1680_s9 + $0x308] sm:$0xff]  ;;  %v475_v63 = vmax.f32 %v1733_v26, %v1736_v27  ;;  %v477_v6 = vmax.f32 %v1757_v34, %v1760_v35  ;;  %v476_v13 = vmax.f32 %v1781_v42, %v1784_v43 }
  0x7c   : > { %873 = vmatprep.mubr.f32.mxu1 %v1461_v0  ;;  %1210 = vmatmul.mubr.msk.f32.vlgmr.msra.gmra.mxu0 %vm571_vm0, %v273_v10  ;;  %v1742_v29 = vld [vmem:[%s1680_s9 + $0x380] sm:$0xff]  ;;  %v1766_v37 = vld [vmem:[%s1680_s9 + $0x390] sm:$0xff]  ;;  %v1790_v45 = vld [vmem:[%s1680_s9 + $0x388] sm:$0xff] }
  0x7d   : > { %1212 = vmatmul.mubr.msk.f32.vlgmr.msra.gmra.mxu1 %vm571_vm0, %v273_v10  ;;  %802 = vmatprep.mubr.f32.mxu0 %v1461_v0  ;;  %v1793_v46 = vld [vmem:[%s1680_s9 + $0x18] sm:$0xff]  ;;  %v1817_v54 = vld [vmem:[%s1680_s9 + $0x40] sm:$0xff]  ;;  %v1853_v4 = vld [vmem:[%s1680_s9 + $0x50] sm:$0xff]  ;;  %v493_v7 = vmax.f32 %v1763_v36, %v1766_v37  ;;  %v492_v14 = vmax.f32 %v1787_v44, %v1790_v45 }
  0x7e   : > { %879 = vmatprep.mubr.f32.mxu1 %v1461_v0  ;;  %890 = vperm.xlu0 %1296, %v886_v20   ;;  %v1796_v47 = vld [vmem:[%s1680_s9 + $0x98] sm:$0xff]  ;;  %v1820_v55 = vld [vmem:[%s1680_s9 + $0xc0] sm:$0xff]  ;;  %v491_v0 = vmax.f32 %v1739_v28, %v1742_v29  ;;  %v1088_v5 = vld [vmem:[%s1680_s9 + $0xd0] sm:$0xff] }
  0x7f   : > { %v1799_v48 = vld [vmem:[%s1680_s9 + $0x118] sm:$0xff]  ;;  %v1823_v56 = vld [vmem:[%s1680_s9 + $0x140] sm:$0xff]  ;;  %v1104_v10 = vld [vmem:[%s1680_s9 + $0x150] sm:$0xff]  ;;  %v451_v22 = vmax.f32 %v1817_v54, %v1820_v55  ;;  %v453_v28 = vmax.f32 %v1853_v4, %v1088_v5 }
  0x80   : > { %1211 = vmatmul.mubr.msk.f32.gmra.mxu0 %vm571_vm0, %v274_v15  ;;  %v1802_v49 = vld [vmem:[%s1680_s9 + $0x198] sm:$0xff]  ;;  %v1826_v57 = vld [vmem:[%s1680_s9 + $0x1c0] sm:$0xff]  ;;  %v1120_v11 = vld [vmem:[%s1680_s9 + $0x1d0] sm:$0xff] }
  0x81   : > { %1213 = vmatmul.mubr.msk.f32.gmra.mxu1 %vm571_vm0, %v274_v15  ;;  %v1805_v50 = vld [vmem:[%s1680_s9 + $0x218] sm:$0xff]  ;;  %v1833_v60 = vld [vmem:[%s1680_s9 + $0x240] sm:$0xff]  ;;  %v1136_v12 = vld [vmem:[%s1680_s9 + $0x250] sm:$0xff]  ;;  %v446_v15 = vmax.f32 %v1793_v46, %v1796_v47  ;;  %v462_v16 = vmax.f32 %v1799_v48, %v1802_v49  ;;  %v467_v23 = vmax.f32 %v1823_v56, %v1826_v57  ;;  %v469_v29 = vmax.f32 %v1104_v10, %v1120_v11 }
  0x82   : > { %895 = vperm.xlu0 %1296, %v887_v21   ;;  %v1808_v51 = vld [vmem:[%s1680_s9 + $0x298] sm:$0xff]  ;;  %v1836_v61 = vld [vmem:[%s1680_s9 + $0x2c0] sm:$0xff]  ;;  %v1152_v17 = vld [vmem:[%s1680_s9 + $0x2d0] sm:$0xff]  ;;  %v1939_v46 = vmax.f32 %v443_v58, %v459_v59  ;;  %v1941_v47 = vmax.f32 %v475_v63, %v491_v0  ;;  %v1943_v48 = vmax.f32 %v445_v1, %v461_v2  ;;  %v1945_v49 = vmax.f32 %v477_v6, %v493_v7 }
  0x83   : > { %v1811_v52 = vld [vmem:[%s1680_s9 + $0x318] sm:$0xff]  ;;  %v1839_v62 = vld [vmem:[%s1680_s9 + $0x340] sm:$0xff]  ;;  %v1168_v18 = vld [vmem:[%s1680_s9 + $0x350] sm:$0xff]  ;;  %v478_v20 = vmax.f32 %v1805_v50, %v1808_v51  ;;  %v483_v26 = vmax.f32 %v1833_v60, %v1836_v61  ;;  %v485_v36 = vmax.f32 %v1136_v12, %v1152_v17  ;;  %v1968_v57 = vmax.f32 %v444_v8, %v460_v9 }
  0x84   : > { %v1814_v53 = vld [vmem:[%s1680_s9 + $0x398] sm:$0xff]  ;;  %v1850_v3 = vld [vmem:[%s1680_s9 + $0x3c0] sm:$0xff]  ;;  %v1184_v19 = vld [vmem:[%s1680_s9 + $0x3d0] sm:$0xff]  ;;  %v1970_v58 = vmax.f32 %v476_v13, %v492_v14  ;;  %v1972_v59 = vmax.f32 %v446_v15, %v462_v16  ;;  %v1981_v0 = vmax.f32 %v451_v22, %v467_v23  ;;  %v1985_v2 = vmax.f32 %v453_v28, %v469_v29 }
  0x85   : > { %v494_v21 = vmax.f32 %v1811_v52, %v1814_v53  ;;  %v1887_v24 = vld [vmem:[%s1680_s9 + $0x48] sm:$0xff]  ;;  %v499_v27 = vmax.f32 %v1839_v62, %v1850_v3  ;;  %v501_v37 = vmax.f32 %v1168_v18, %v1184_v19  ;;  %v1916_v38 = vld [vmem:[%s1680_s9 + $0x58] sm:$0xff]  ;;  %v1948_v50 = vld [vmem:[%s1680_s9 + $0x20] sm:$0xff] }
  0x86   : > { %v1890_v25 = vld [vmem:[%s1680_s9 + $0xc8] sm:$0xff]  ;;  %v1919_v39 = vld [vmem:[%s1680_s9 + $0xd8] sm:$0xff]  ;;  %v1951_v51 = vld [vmem:[%s1680_s9 + $0xa0] sm:$0xff] }
  0x87   : > { %v1898_v30 = vld [vmem:[%s1680_s9 + $0x148] sm:$0xff]  ;;  %v1922_v40 = vld [vmem:[%s1680_s9 + $0x158] sm:$0xff]  ;;  %v1954_v52 = vld [vmem:[%s1680_s9 + $0x120] sm:$0xff]  ;;  %v1974_v60 = vmax.f32 %v478_v20, %v494_v21  ;;  %v1983_v1 = vmax.f32 %v483_v26, %v499_v27  ;;  %v452_v3 = vmax.f32 %v1887_v24, %v1890_v25  ;;  %v1992_v7 = vmax.f32 %v485_v36, %v501_v37 }
  0x88   : > { %v1901_v31 = vld [vmem:[%s1680_s9 + $0x1c8] sm:$0xff]  ;;  %v1925_v41 = vld [vmem:[%s1680_s9 + $0x1d8] sm:$0xff]  ;;  %v1957_v53 = vld [vmem:[%s1680_s9 + $0x1a0] sm:$0xff]  ;;  %v454_v14 = vmax.f32 %v1916_v38, %v1919_v39  ;;  %v447_v18 = vmax.f32 %v1948_v50, %v1951_v51  ;;  %v541_v36 = vmax.f32 %v1943_v48, %v1945_v49  ;;  %v540_v37 = vmax.f32 %v1968_v57, %v1970_v58 }
  0x89   : > { %v1904_v32 = vld [vmem:[%s1680_s9 + $0x248] sm:$0xff]  ;;  %v1928_v42 = vld [vmem:[%s1680_s9 + $0x258] sm:$0xff]  ;;  %v1960_v54 = vld [vmem:[%s1680_s9 + $0x220] sm:$0xff]  ;;  %v468_v8 = vmax.f32 %v1898_v30, %v1901_v31  ;;  %v470_v15 = vmax.f32 %v1922_v40, %v1925_v41  ;;  %v463_v19 = vmax.f32 %v1954_v52, %v1957_v53  ;;  %v542_v38 = vmax.f32 %v1972_v59, %v1974_v60 }
  0x8a   : > { %v1907_v33 = vld [vmem:[%s1680_s9 + $0x2c8] sm:$0xff]  ;;  %v1931_v43 = vld [vmem:[%s1680_s9 + $0x2d8] sm:$0xff]  ;;  %v1963_v55 = vld [vmem:[%s1680_s9 + $0x2a0] sm:$0xff] }
  0x8b   : > { %v1910_v34 = vld [vmem:[%s1680_s9 + $0x348] sm:$0xff]  ;;  %v1934_v44 = vld [vmem:[%s1680_s9 + $0x358] sm:$0xff]  ;;  %v1966_v56 = vld [vmem:[%s1680_s9 + $0x320] sm:$0xff]  ;;  %v484_v9 = vmax.f32 %v1904_v32, %v1907_v33  ;;  %v486_v16 = vmax.f32 %v1928_v42, %v1931_v43  ;;  %v479_v20 = vmax.f32 %v1960_v54, %v1963_v55  ;;  %v2075_v52 = vmax.f32 %v454_v14, %v470_v15 }
  0x8c   : > { %v1913_v35 = vld [vmem:[%s1680_s9 + $0x3c8] sm:$0xff]  ;;  %v1937_v45 = vld [vmem:[%s1680_s9 + $0x3d8] sm:$0xff]  ;;  %v1178_v61 = vld [vmem:[%s1680_s9 + $0x3a0] sm:$0xff]  ;;  %v2079_v54 = vmax.f32 %v447_v18, %v463_v19 }
  0x8d   : > { %v1978_v62 = vld [vmem:[%s1680_s9 + $0x30] sm:$0xff]  ;;  %v500_v10 = vmax.f32 %v1910_v34, %v1913_v35  ;;  %v502_v17 = vmax.f32 %v1934_v44, %v1937_v45  ;;  %v495_v21 = vmax.f32 %v1966_v56, %v1178_v61  ;;  %v2019_v22 = vld [vmem:[%s1680_s9 + $0x28] sm:$0xff]  ;;  %v1190_v33 = vld [vmem:[%s1680_s9 + $0x400] sm:$0xff]  ;;  %v539_v34 = vmax.f32 %v1939_v46, %v1941_v47 }
  0x8e   : > { %v1084_v63 = vld [vmem:[%s1680_s9 + $0xb0] sm:$0xff]  ;;  %v2022_v23 = vld [vmem:[%s1680_s9 + $0xa8] sm:$0xff]  ;;  %v2054_v40 = vld [vmem:[%s1680_s9 + $0x38] sm:$0xff]  ;;  %v547_v45 = vmax.f32 %v1981_v0, %v1983_v1  ;;  %v549_v46 = vmax.f32 %v1985_v2, %v1992_v7  ;;  %v2066_v47 = vmax.f32 %v452_v3, %v468_v8 }
  0x8f   : > { %v1100_v4 = vld [vmem:[%s1680_s9 + $0x130] sm:$0xff]  ;;  %v2025_v24 = vld [vmem:[%s1680_s9 + $0x128] sm:$0xff]  ;;  %v449_v26 = vmax.f32 %v1978_v62, %v1084_v63  ;;  %v2057_v41 = vld [vmem:[%s1680_s9 + $0xb8] sm:$0xff]  ;;  %v2068_v48 = vmax.f32 %v484_v9, %v500_v10  ;;  %v2077_v53 = vmax.f32 %v486_v16, %v502_v17  ;;  %v2081_v55 = vmax.f32 %v479_v20, %v495_v21 }
  0x90   : > { %v1116_v5 = vld [vmem:[%s1680_s9 + $0x1b0] sm:$0xff]  ;;  %v2028_v25 = vld [vmem:[%s1680_s9 + $0x1a8] sm:$0xff]  ;;  %v1193_v43 = vld [vmem:[%s1680_s9 + $0x418] sm:$0xff]  ;;  %v448_v62 = vmax.f32 %v2019_v22, %v2022_v23 }
  0x91   : > { %v1132_v6 = vld [vmem:[%s1680_s9 + $0x230] sm:$0xff]  ;;  %v465_v27 = vmax.f32 %v1100_v4, %v1116_v5  ;;  %v2032_v30 = vld [vmem:[%s1680_s9 + $0x228] sm:$0xff]  ;;  %v1198_v44 = vld [vmem:[%s1680_s9 + $0x440] sm:$0xff]  ;;  %v464_v63 = vmax.f32 %v2025_v24, %v2028_v25  ;;  %v450_v4 = vmax.f32 %v2054_v40, %v2057_v41  ;;  %v2150_v25 = vmax.f32 %v542_v38, %v1193_v43 }
  0x92   : > { %v1148_v11 = vld [vmem:[%s1680_s9 + $0x2b0] sm:$0xff]  ;;  %v2035_v31 = vld [vmem:[%s1680_s9 + $0x2a8] sm:$0xff]  ;;  %v1101_v49 = vld [vmem:[%s1680_s9 + $0x138] sm:$0xff] }
  0x93   : > { %v1164_v12 = vld [vmem:[%s1680_s9 + $0x330] sm:$0xff]  ;;  %v481_v28 = vmax.f32 %v1132_v6, %v1148_v11  ;;  %v2038_v32 = vld [vmem:[%s1680_s9 + $0x328] sm:$0xff]  ;;  %v1117_v50 = vld [vmem:[%s1680_s9 + $0x1b8] sm:$0xff]  ;;  %v2087_v60 = vmax.f32 %v449_v26, %v465_v27  ;;  %v480_v2 = vmax.f32 %v2032_v30, %v2035_v31  ;;  %v2152_v26 = vmax.f32 %v547_v45, %v1198_v44 }
  0x94   : > { %v1180_v13 = vld [vmem:[%s1680_s9 + $0x3b0] sm:$0xff]  ;;  %v2051_v39 = vld [vmem:[%s1680_s9 + $0x3a8] sm:$0xff]  ;;  %v2073_v51 = vld [vmem:[%s1680_s9 + $0x238] sm:$0xff]  ;;  %v466_v5 = vmax.f32 %v1101_v49, %v1117_v50 }
  0x95   : > { %v497_v29 = vmax.f32 %v1164_v12, %v1180_v13  ;;  %v1192_v35 = vld [vmem:[%s1680_s9 + $0x410] sm:$0xff]  ;;  %v1191_v42 = vld [vmem:[%s1680_s9 + $0x408] sm:$0xff]  ;;  %v1149_v56 = vld [vmem:[%s1680_s9 + $0x2b8] sm:$0xff]  ;;  %v496_v3 = vmax.f32 %v2038_v32, %v2051_v39  ;;  %v2125_v12 = vmax.f32 %v539_v34, %v1190_v33 }
  0x96   : > { %v1165_v57 = vld [vmem:[%s1680_s9 + $0x338] sm:$0xff]  ;;  %v1200_v59 = vld [vmem:[%s1680_s9 + $0x450] sm:$0xff]  ;;  %v2096_v0 = vld [vmem:[%s1680_s9 + $0x60] sm:$0xff]  ;;  %v2127_v13 = vmax.f32 %v541_v36, %v1192_v35  ;;  %v482_v14 = vmax.f32 %v2073_v51, %v1149_v56  ;;  %v2148_v24 = vmax.f32 %v540_v37, %v1191_v42  ;;  %v548_v35 = vmax.f32 %v2066_v47, %v2068_v48 }
  0x97   : > { %v1181_v58 = vld [vmem:[%s1680_s9 + $0x3b8] sm:$0xff]  ;;  %v2089_v61 = vmax.f32 %v481_v28, %v497_v29  ;;  %v2099_v1 = vld [vmem:[%s1680_s9 + $0xe0] sm:$0xff]  ;;  %v2131_v16 = vld [vmem:[%s1680_s9 + $0x70] sm:$0xff]  ;;  %v2154_v27 = vmax.f32 %v549_v46, %v1200_v59  ;;  %v550_v36 = vmax.f32 %v2075_v52, %v2077_v53  ;;  %v543_v37 = vmax.f32 %v2079_v54, %v2081_v55 }
  0x98   : > { %v2108_v6 = vld [vmem:[%s1680_s9 + $0x160] sm:$0xff]  ;;  %v498_v15 = vmax.f32 %v1165_v57, %v1181_v58  ;;  %v2134_v17 = vld [vmem:[%s1680_s9 + $0xf0] sm:$0xff]  ;;  %v2157_v28 = vld [vmem:[%s1680_s9 + $0x68] sm:$0xff]  ;;  %v512_v42 = vmax.f32 %v448_v62, %v464_v63  ;;  %v528_v43 = vmax.f32 %v480_v2, %v496_v3  ;;  %v514_v44 = vmax.f32 %v450_v4, %v466_v5 }
  0x99   : > { %v2111_v7 = vld [vmem:[%s1680_s9 + $0x1e0] sm:$0xff]  ;;  %v2137_v18 = vld [vmem:[%s1680_s9 + $0x170] sm:$0xff]  ;;  %v2160_v29 = vld [vmem:[%s1680_s9 + $0xe8] sm:$0xff]  ;;  %v545_v38 = vmax.f32 %v2087_v60, %v2089_v61  ;;  %v455_v45 = vmax.f32 %v2096_v0, %v2099_v1  ;;  %v457_v58 = vmax.f32 %v2131_v16, %v2134_v17 }
  0x9a   : > { %v2114_v8 = vld [vmem:[%s1680_s9 + $0x260] sm:$0xff]  ;;  %v2140_v19 = vld [vmem:[%s1680_s9 + $0x1f0] sm:$0xff]  ;;  %v1107_v30 = vld [vmem:[%s1680_s9 + $0x168] sm:$0xff]  ;;  %v530_v49 = vmax.f32 %v482_v14, %v498_v15  ;;  %v471_v50 = vmax.f32 %v2108_v6, %v2111_v7  ;;  %v456_v62 = vmax.f32 %v2157_v28, %v2160_v29 }
  0x9b   : > { %v2117_v9 = vld [vmem:[%s1680_s9 + $0x2e0] sm:$0xff]  ;;  %v2143_v20 = vld [vmem:[%s1680_s9 + $0x270] sm:$0xff]  ;;  %v1123_v31 = vld [vmem:[%s1680_s9 + $0x1e8] sm:$0xff]  ;;  %v473_v59 = vmax.f32 %v2137_v18, %v2140_v19 }
  0x9c   : > { %v2120_v10 = vld [vmem:[%s1680_s9 + $0x360] sm:$0xff]  ;;  %v1156_v21 = vld [vmem:[%s1680_s9 + $0x2f0] sm:$0xff]  ;;  %v1139_v32 = vld [vmem:[%s1680_s9 + $0x268] sm:$0xff]  ;;  %v487_v51 = vmax.f32 %v2114_v8, %v2117_v9  ;;  %v472_v63 = vmax.f32 %v1107_v30, %v1123_v31  ;;  %v546_v14 = vmax.f32 %v514_v44, %v530_v49  ;;  %v519_v17 = vmax.f32 %v455_v45, %v471_v50 }
  0x9d   : > { %v2123_v11 = vld [vmem:[%s1680_s9 + $0x3e0] sm:$0xff]  ;;  %v1172_v22 = vld [vmem:[%s1680_s9 + $0x370] sm:$0xff]  ;;  %v1155_v33 = vld [vmem:[%s1680_s9 + $0x2e8] sm:$0xff]  ;;  %v489_v60 = vmax.f32 %v2143_v20, %v1156_v21  ;;  %v521_v19 = vmax.f32 %v457_v58, %v473_v59 }
  0x9e   : > { %v1188_v23 = vld [vmem:[%s1680_s9 + $0x3f0] sm:$0xff]  ;;  %v1171_v34 = vld [vmem:[%s1680_s9 + $0x368] sm:$0xff]  ;;  %v306_v40 = vld [vmem:[%s1680_s9 + $0x78] sm:$0xff]  ;;  %v503_v52 = vmax.f32 %v2120_v10, %v2123_v11  ;;  %v488_v0 = vmax.f32 %v1139_v32, %v1155_v33  ;;  %v544_v11 = vmax.f32 %v512_v42, %v528_v43  ;;  %v520_v33 = vmax.f32 %v456_v62, %v472_v63 }
  0x9f   : > { %v1187_v39 = vld [vmem:[%s1680_s9 + $0x3e8] sm:$0xff]  ;;  %v1093_v41 = vld [vmem:[%s1680_s9 + $0xf8] sm:$0xff]  ;;  %v505_v61 = vmax.f32 %v1172_v22, %v1188_v23  ;;  %v1194_v2 = vld [vmem:[%s1680_s9 + $0x420] sm:$0xff] }
  0xa0   : > { %v1109_v46 = vld [vmem:[%s1680_s9 + $0x178] sm:$0xff]  ;;  %v1199_v56 = vld [vmem:[%s1680_s9 + $0x448] sm:$0xff]  ;;  %v504_v1 = vmax.f32 %v1171_v34, %v1187_v39  ;;  %v1196_v3 = vld [vmem:[%s1680_s9 + $0x430] sm:$0xff]  ;;  %v458_v4 = vmax.f32 %v306_v40, %v1093_v41  ;;  %v535_v18 = vmax.f32 %v487_v51, %v503_v52  ;;  %v559_v23 = vmax.f32 %v543_v37, %v1194_v2 }
  0xa1   : > { %v1125_v47 = vld [vmem:[%s1680_s9 + $0x1f8] sm:$0xff]  ;;  %v564_v9 = vmax.f32 %v548_v35, %v1199_v56  ;;  %v537_v20 = vmax.f32 %v489_v60, %v505_v61  ;;  %v561_v28 = vmax.f32 %v545_v38, %v1196_v3  ;;  %v1195_v29 = vld [vmem:[%s1680_s9 + $0x428] sm:$0xff]  ;;  %v1204_v49 = vld [vmem:[%s1680_s9 + $0x470] sm:$0xff] }
  0xa2   : > { %v1141_v48 = vld [vmem:[%s1680_s9 + $0x278] sm:$0xff]  ;;  %v474_v5 = vmax.f32 %v1109_v46, %v1125_v47  ;;  %v536_v34 = vmax.f32 %v488_v0, %v504_v1  ;;  %v560_v41 = vmax.f32 %v544_v11, %v1195_v29  ;;  %v551_v43 = vmax.f32 %v519_v17, %v535_v18 }
  0xa3   : > { %v1157_v53 = vld [vmem:[%s1680_s9 + $0x2f8] sm:$0xff]  ;;  %v553_v44 = vmax.f32 %v521_v19, %v537_v20 }
  0xa4   : > { %v1173_v54 = vld [vmem:[%s1680_s9 + $0x378] sm:$0xff]  ;;  %v490_v6 = vmax.f32 %v1141_v48, %v1157_v53  ;;  %v522_v35 = vmax.f32 %v458_v4, %v474_v5 }
  0xa5   : > { %v1189_v55 = vld [vmem:[%s1680_s9 + $0x3f8] sm:$0xff]  ;;  %v569_v1 = vmax.f32 %v553_v44, %v1204_v49 }
  0xa6   : > { %v1201_v57 = vld [vmem:[%s1680_s9 + $0x458] sm:$0xff]  ;;  %v506_v7 = vmax.f32 %v1173_v54, %v1189_v55  ;;  %v552_v54 = vmax.f32 %v520_v33, %v536_v34 }
  0xa7   : > { %v566_v10 = vmax.f32 %v550_v36, %v1201_v57  ;;  %v1197_v30 = vld [vmem:[%s1680_s9 + $0x438] sm:$0xff] }
  0xa8   : > { %v538_v36 = vmax.f32 %v490_v6, %v506_v7  ;;  %v562_v42 = vmax.f32 %v546_v14, %v1197_v30  ;;  %v1205_v60 = vld [vmem:[%s1680_s9 + $0x478] sm:$0xff] }
  0xaa   : > { %v554_v55 = vmax.f32 %v522_v35, %v538_v36 }
  0xac   : > { %v570_v14 = vmax.f32 %v554_v55, %v1205_v60 }
  0xf9   : > { %v2203_v8 = vpop.permute.xlu0 %890 }
  0xfd   : > { %v2215_v48 = vpop.permute.xlu0 %895 }
 0x134   : > { %v644_v15 = vpop.f32.mrf.mxu0 }
 0x135   : > { %v721_v16 = vpop.f32.mrf.mxu1  ;;  %v645_v21 = vadd.f32 %v644_v15, %v2125_v12 }
 0x136   : > { %v722_v22 = vadd.f32 %v721_v16, %v2127_v13  ;;  %v646_v31 = vpop.f32.mrf.mxu0 }
 0x137   : > { %v723_v32 = vpop.f32.mrf.mxu1  ;;  %v647_v39 = vadd.f32 %v646_v31, %v2148_v24  ;;  %v898_v12 = vadd.f32 %v2203_v8, %v645_v21 }
 0x138   : > { %v724_v40 = vadd.f32 %v723_v32, %v2150_v25  ;;  %v900_v13 = vadd.f32 %v2203_v8, %v722_v22  ;;  %v650_v37 = vpop.f32.mrf.mxu0  ;;  %v1202_v25 = vld [vmem:[%s1680_s9 + $0x460] sm:$0xff] }
 0x139   : > { %v727_v38 = vpop.f32.mrf.mxu1  ;;  %v899_v45 = vadd.f32 %v2203_v8, %v647_v39  ;;  %v914_v47 = vmax.f32 %v898_v12, 0.0  ;;  %v651_v50 = vadd.f32 %v650_v37, %v2152_v26  ;;  %v1203_v26 = vld [vmem:[%s1680_s9 + $0x468] sm:$0xff]  ;;  %v567_v0 = vmax.f32 %v551_v43, %v1202_v25 }
 0x13a   : > { %v901_v46 = vadd.f32 %v2203_v8, %v724_v40  ;;  %v916_v24 = vmax.f32 %v900_v13, 0.0  ;;  %v728_v51 = vadd.f32 %v727_v38, %v2154_v27  ;;  %v652_v52 = vpop.f32.mrf.mxu0  ;;  %v568_v11 = vmax.f32 %v552_v54, %v1203_v26 }
 0x13b   : > { %v729_v53 = vpop.f32.mrf.mxu1  ;;  %v915_v56 = vmax.f32 %v899_v45, 0.0  ;;  %930 = vst [vmem:[%s2223_s25] sm:$0xff] %v914_v47  ;;  %v653_v58 = vadd.f32 %v652_v52, %v564_v9  ;;  %v906_v27 = vadd.f32 %v2215_v48, %v651_v50 }
 0x13c   : > { %v917_v57 = vmax.f32 %v901_v46, 0.0  ;;  %932 = vst [vmem:[%s2223_s25 + $0x10] sm:$0xff] %v916_v24  ;;  %v730_v59 = vadd.f32 %v729_v53, %v566_v10  ;;  %v908_v61 = vadd.f32 %v2215_v48, %v728_v51  ;;  %v798_v62 = vpop.f32.mrf.mxu0 }
 0x13d   : > { %v875_v63 = vpop.f32.mrf.mxu1  ;;  %931 = vst [vmem:[%s2223_s25 + $0x8] sm:$0xff] %v915_v56  ;;  %v907_v2 = vadd.f32 %v2215_v48, %v653_v58  ;;  %v799_v4 = vadd.f32 %v798_v62, %v559_v23  ;;  %v922_v6 = vmax.f32 %v906_v27, 0.0 }
 0x13e   : > { %933 = vst [vmem:[%s2223_s25 + $0x18] sm:$0xff] %v917_v57  ;;  %v909_v3 = vadd.f32 %v2215_v48, %v730_v59  ;;  %v876_v5 = vadd.f32 %v875_v63, %v561_v28  ;;  %v924_v7 = vmax.f32 %v908_v61, 0.0  ;;  %v800_v9 = vpop.f32.mrf.mxu0 }
 0x13f   : > { %v877_v10 = vpop.f32.mrf.mxu1  ;;  %v923_v15 = vmax.f32 %v907_v2, 0.0  ;;  %v902_v17 = vadd.f32 %v2203_v8, %v799_v4  ;;  %938 = vst [vmem:[%s2223_s25 + $0x40] sm:$0xff] %v922_v6  ;;  %v801_v19 = vadd.f32 %v800_v9, %v560_v41 }
 0x140   : > { %v925_v16 = vmax.f32 %v909_v3, 0.0  ;;  %v904_v18 = vadd.f32 %v2203_v8, %v876_v5  ;;  %940 = vst [vmem:[%s2223_s25 + $0x50] sm:$0xff] %v924_v7  ;;  %v878_v20 = vadd.f32 %v877_v10, %v562_v42  ;;  %v804_v21 = vpop.f32.mrf.mxu0 }
 0x141   : > { %v881_v22 = vpop.f32.mrf.mxu1  ;;  %939 = vst [vmem:[%s2223_s25 + $0x48] sm:$0xff] %v923_v15  ;;  %v918_v23 = vmax.f32 %v902_v17, 0.0  ;;  %v805_v29 = vadd.f32 %v804_v21, %v567_v0  ;;  %v903_v31 = vadd.f32 %v2203_v8, %v801_v19 }
 0x142   : > { %941 = vst [vmem:[%s2223_s25 + $0x58] sm:$0xff] %v925_v16  ;;  %v920_v28 = vmax.f32 %v904_v18, 0.0  ;;  %v882_v30 = vadd.f32 %v881_v22, %v569_v1  ;;  %v905_v32 = vadd.f32 %v2203_v8, %v878_v20  ;;  %v806_v33 = vpop.f32.mrf.mxu0 }
 0x143   : > { %v883_v34 = vpop.f32.mrf.mxu1  ;;  %934 = vst [vmem:[%s2223_s25 + $0x20] sm:$0xff] %v918_v23  ;;  %v910_v35 = vadd.f32 %v2215_v48, %v805_v29  ;;  %v807_v39 = vadd.f32 %v806_v33, %v568_v11  ;;  %v919_v12 = vmax.f32 %v903_v31, 0.0 }
 0x144   : > { %936 = vst [vmem:[%s2223_s25 + $0x30] sm:$0xff] %v920_v28  ;;  %v912_v36 = vadd.f32 %v2215_v48, %v882_v30  ;;  %v884_v40 = vadd.f32 %v883_v34, %v570_v14  ;;  %v921_v8 = vmax.f32 %v905_v32, 0.0 }
 0x145   : > { %v926_v13 = vmax.f32 %v910_v35, 0.0  ;;  %v911_v38 = vadd.f32 %v2215_v48, %v807_v39  ;;  %935 = vst [vmem:[%s2223_s25 + $0x28] sm:$0xff] %v919_v12 }
 0x146   : > { %v928_v37 = vmax.f32 %v912_v36, 0.0  ;;  %v913_v41 = vadd.f32 %v2215_v48, %v884_v40  ;;  %937 = vst [vmem:[%s2223_s25 + $0x38] sm:$0xff] %v921_v8 }
 0x147   : > { %942 = vst [vmem:[%s2223_s25 + $0x60] sm:$0xff] %v926_v13  ;;  %v927_v42 = vmax.f32 %v911_v38, 0.0 }
 0x148   : > { %944 = vst [vmem:[%s2223_s25 + $0x70] sm:$0xff] %v928_v37  ;;  %v929_v43 = vmax.f32 %v913_v41, 0.0 }
 0x149   : > { %943 = vst [vmem:[%s2223_s25 + $0x68] sm:$0xff] %v927_v42 }
 0x14a   : > { %945 = vst [vmem:[%s2223_s25 + $0x78] sm:$0xff] %v929_v43 }
 0x14b   : > { %1392 = shalt.err (!%p1389_p12)
}
 0x14c   : > { %s1393_s13 = scalar_lea.hbm %s2254_s7, 2048  ;;  %s1397_s29 = scalar_lea.hbm %s2309_s4, 4096 }
 0x14d   : > { %p1394_p1 = scmp.ne.s32.totalorder %s2254_s7, %s1393_s13  ;;  %p1398_p3 = scmp.lt.s32.totalorder %s2254_s7, %s2309_s4 }
 0x14e   : > { %p1399_p6 = scmp.lt.s32.totalorder %s1397_s29, %s1393_s13 }
 0x14f   : > { %p1395_p0 = pnand %p1394_p1, %p2327_p11 }
 0x150   : > { %p1400_p2 = por %p1399_p6, %p1398_p3 }
 0x151   : > { %p1396_p13 = pneg %p1395_p0 }
 0x153   : > { %p1401_p4 = pnand %p1400_p2, %p1396_p13 }
 0x155   : > { %1404 = shalt.err (!%p1401_p4)
}
 0x156   : > { %s1464_s12 = smov 1024   ;;  %s1465_s22 = smov 2048  }
 0x157   : > { %s1466_s5 = smov 64  }
 0x158   : > { %1232 = dma.vmem_to_hbm [thread:$0]  (%p2327_p11), %s2258_s8, 2048, %s2254_s7, %s947_s6, %s1464_s12, %s1465_s22, %s1466_s5  }
 0x159 PF: > { %s975_s25 = sand.u32 1, %s1439_s15   ;;  %p2328_p7 = scmp.ne.s32.totalorder %s2319_s28, 0 }
 0x15a   : > { %p2329_p8 = scmp.ge.s32.totalorder %s1451_s18, 2  ;;  %s976_s20 = scalar_lea.sflag [#allocation4], %s975_s25 }
 0x15c   : > { %p1246_p9 = pnand %p2329_p8, %p2328_p7 }
 0x15e   : > { %p1247_p10 = pneg %p1246_p9 }
 0x160   : > { %1434 = dma.done.wait (%p1247_p10), %s976_s20, 2048  }
 0x161   : > { %1436 = vsyncadd (%p1247_p10), %s976_s20, 4294965248  ;;  %s2330_s19 = sld [smem:[#allocation13_spill]]  ;;  %p20_p5 = scmp.ge.s32.totalorder %s1517_s21, 4  }
 0x162   : > { %s2331_s15 = smov %s1443_s16  ;;  %s2332_s16 = smov %s1447_s17 }
 0x163   : > { %s2334_s18 = smov %s1517_s21  ;;  %22 = sbr.rel (!%p20_p5) target bundleno = 10 (0xa), region = 106 }
 0x167   : > { %s2333_s17 = smov %s2330_s19 }
 0x168   :  { %981 = vsyncpa [#allocation3], 1 }
 0x169   :  { %983 = vsyncpa [#allocation3 + $0x1], 1 }
 0x16a   :  { %984 = vsyncpa [#allocation6], 1 }
 0x16b   :  { %986 = vsyncpa [#allocation6 + $0x1], 1 }
 0x16c   :  { %987 = vsyncpa [#allocation4], 1 }
 0x16d   :  { %989 = vsyncpa [#allocation4 + $0x1], 1 }

</bundles_post_ra>
